<compile_context>
chip_gen: v7x
topology: tpu7x:2x2x1
jax: 0.10.0
libtpu: 0.0.40
codegen_flags: <defaults>
</compile_context>

<pallas_src>
import jax
import jax.numpy as jnp
from jax.experimental import pallas as pl
from jax.experimental.pallas import tpu as pltpu


def _make_one_conv_kernel(H, W, L, C_IN, C_OUT, B_T):
    """Kernel factory.  L = lane-padded H*W (multiple of 128)."""

    def kernel(x_ref, w_ref, b_ref, out_ref):
        # x_ref   : (B_T, C_IN, L)      B_T images, channels-first, flat spatial
        # w_ref   : (9, C_OUT, C_IN)    conv weight, tap-major (ky, kx)
        # b_ref   : (C_OUT, 1)
        # out_ref : (B_T, C_OUT, L)

        # ---- hoisted: per-lane (row, col) coords and the 9 border masks ----
        lane = jax.lax.broadcasted_iota(jnp.int32, (1, L), 1)
        if (W & (W - 1)) == 0:  # power-of-two fast path (shifts/ands only)
            col = lane & (W - 1)
            row = lane >> (W.bit_length() - 1)
        else:
            col = lane % W
            row = lane // W

        row_ok = {-1: row >= 1, 0: None, 1: row < (H - 1)}
        col_ok = {-1: col >= 1, 0: None, 1: col < (W - 1)}

        taps = []  # (lane shift d, validity mask or None), tap order (ky, kx)
        for ky in (-1, 0, 1):
            for kx in (-1, 0, 1):
                r, c = row_ok[ky], col_ok[kx]
                if r is None and c is None:
                    mask = None
                elif r is None:
                    mask = c
                elif c is None:
                    mask = r
                else:
                    mask = r & c
                taps.append((ky * W + kx, mask))

        # ---- hoisted: per-tap weight tiles and bias (reused across images) --
        w_taps = [w_ref[t] for t in range(9)]   # each (C_OUT, C_IN)
        bias = b_ref[...]                       # (C_OUT, 1)

        # ---- per-image: 9 rolls -> mask -> accumulate 9 MXU matmuls --------
        for img in range(B_T):
            x = x_ref[img]                      # (C_IN, L)
            acc = None
            for t, (d, mask) in enumerate(taps):
                v = x if d == 0 else pltpu.roll(x, (-d) % L, 1)
                if mask is not None:
                    v = jnp.where(mask, v, 0.0)
                part = jnp.dot(w_taps[t], v, preferred_element_type=jnp.float32)
                acc = part if acc is None else acc + part
            y = jnp.maximum(acc + bias, 0.0)    # bias + ReLU, lane-dense
            out_ref[img] = y.astype(out_ref.dtype)

    return kernel


def one_conv_forward(x_nchw, w_oihw, b, *, io_dtype=None,
                     max_images_per_step=8,
                     vmem_budget_bytes=8 * 1024 * 1024):
    """Forward of `one_conv` (normaliz=False).

    x_nchw : (N, C_IN, H, W)
    w_oihw : (C_OUT, C_IN, 3, 3)  (PyTorch nn.Conv2d weight layout)
    b      : (C_OUT,)
    io_dtype : optionally carry activations across the pallas_call boundary in
               a narrower dtype (e.g. jnp.bfloat16) to halve HBM bytes; MXU
               accumulation stays f32.  Default: keep input dtype (f32).
    Returns (N, C_OUT, H, W) in the activation dtype.
    """
    N, C_IN, H, W = x_nchw.shape
    C_OUT = w_oihw.shape[0]
    HW = H * W
    L = pl.cdiv(HW, 128) * 128          # lane-padded flat spatial length

    if io_dtype is not None:
        x_nchw = x_nchw.astype(io_dtype)
    act_dtype = x_nchw.dtype

    # Only free, contiguous reshapes on the activation -- no transpose.
    x_flat = x_nchw.reshape(N, C_IN, HW)
    if L != HW:
        # Pad value is irrelevant: unmasked taps never read indices >= H*W.
        x_flat = jnp.pad(x_flat, ((0, 0), (0, 0), (0, L - HW)))

    # Weight -> tap-major (ky, kx, C_OUT, C_IN); tiny tensor, transpose is free.
    w_taps = jnp.transpose(w_oihw, (2, 3, 0, 1)).reshape(9, C_OUT, C_IN)
    w_taps = w_taps.astype(act_dtype)
    b_col = b.reshape(C_OUT, 1).astype(jnp.float32)

    # Images per grid step: amortise per-step overhead while staying well
    # inside the scoped VMEM default on all generations (v5e 16 MiB .. v7x
    # 32 MiB) and keeping the unrolled trace small.
    bytes_per = jnp.dtype(act_dtype).itemsize
    per_img = (C_IN + C_OUT) * L * bytes_per * 2   # in+out, double-buffered
    bt = max(1, min(N, max_images_per_step,
                    vmem_budget_bytes // max(per_img, 1)))
    while N % bt:                                   # keep the grid exact
        bt -= 1

    kernel = _make_one_conv_kernel(H, W, L, C_IN, C_OUT, bt)

    out_flat = pl.pallas_call(
        kernel,
        out_shape=jax.ShapeDtypeStruct((N, C_OUT, L), act_dtype),
        grid_spec=pltpu.PrefetchScalarGridSpec(
            num_scalar_prefetch=0,
            grid=(N // bt,),
            in_specs=[
                pl.BlockSpec((bt, C_IN, L), lambda n: (n, 0, 0)),
                pl.BlockSpec((9, C_OUT, C_IN), lambda n: (0, 0, 0)),
                pl.BlockSpec((C_OUT, 1), lambda n: (0, 0)),
            ],
            out_specs=pl.BlockSpec((bt, C_OUT, L), lambda n: (n, 0, 0)),
        ),
        compiler_params=pltpu.CompilerParams(
            dimension_semantics=("parallel",),
        ),
    )(x_flat, w_taps, b_col)

    if L != HW:
        out_flat = out_flat[..., :HW]
    # (N, C_OUT, H*W) is NCHW already; reshape is contiguous (free).
    return out_flat.reshape(N, C_OUT, H, W)


def _reference(x_nchw, w_oihw, b):
    """Plain-JAX reference of the PyTorch module (NCHW / OIHW)."""
    y = jax.lax.conv_general_dilated(
        x_nchw, w_oihw, window_strides=(1, 1), padding=[(1, 1), (1, 1)],
        dimension_numbers=("NCHW", "OIHW", "NCHW"))
    return jnp.maximum(y + b[None, :, None, None], 0.0)


if __name__ == "__main__":
    # Small shapes consistent with the module: batch=2, in_ch=4, out_ch=8, 16x16.
    N, C_IN, C_OUT, H, W = 2, 4, 8, 16, 16

    key = jax.random.PRNGKey(0)
    kx, kw, kb = jax.random.split(key, 3)

    x = jax.random.normal(kx, (N, C_IN, H, W), dtype=jnp.float32)
    # Deterministic synthetic Conv2d parameters (PyTorch OIHW layout).
    w = jax.random.normal(kw, (C_OUT, C_IN, 3, 3), jnp.float32) * 0.1
    b = jax.random.normal(kb, (C_OUT,), jnp.float32) * 0.1

    out = jax.block_until_ready(one_conv_forward(x, w, b))
    ref = jax.block_until_ready(_reference(x, w, b))

    assert out.shape == (N, C_OUT, H, W)
    assert jnp.allclose(out, ref, atol=1e-4, rtol=1e-4), "mismatch vs reference"
    print("KERNEL_OK")
</pallas_src>

<mosaic_0001>
module attributes {stable_mosaic.version = 11 : i64} {
  func.func @kernel(%arg0: i32, %arg1: memref<2x4x256xf32, #tpu.memory_space<vmem>>, %arg2: memref<9x8x4xf32, #tpu.memory_space<vmem>>, %arg3: memref<8x1xf32, #tpu.memory_space<vmem>>, %arg4: memref<2x8x256xf32, #tpu.memory_space<vmem>>) attributes {dimension_semantics = [#tpu.dimension_semantics<parallel>], iteration_bounds = array<i64: 1>, scalar_prefetch = 0 : i64, scratch_operands = 0 : i64, tpu.core_type = #tpu.core_type<tc>, window_params = [{transform_indices = @transform_0, window_bounds = array<i64: 2, 4, 256>}, {pipeline_mode = #tpu.pipeline_mode<synchronous>, transform_indices = @transform_1, window_bounds = array<i64: 9, 8, 4>}, {pipeline_mode = #tpu.pipeline_mode<synchronous>, transform_indices = @transform_2, window_bounds = array<i64: 8, 1>}, {transform_indices = @transform_3, window_bounds = array<i64: 2, 8, 256>}]} {
    %0 = tpu.iota {dimensions = array<i32: 1>} : vector<1x256xi32>
    %c15_i32 = arith.constant 15 : i32
    %1 = vector.broadcast %c15_i32 : i32 to vector<1x256xi32>
    %2 = arith.andi %0, %1 : vector<1x256xi32>
    %c4_i32 = arith.constant 4 : i32
    %3 = vector.broadcast %c4_i32 : i32 to vector<1x256xi32>
    %4 = arith.shrsi %0, %3 : vector<1x256xi32>
    %c1_i32 = arith.constant 1 : i32
    %5 = vector.broadcast %c1_i32 : i32 to vector<1x256xi32>
    %6 = arith.cmpi sge, %4, %5 : vector<1x256xi32>
    %c15_i32_0 = arith.constant 15 : i32
    %7 = vector.broadcast %c15_i32_0 : i32 to vector<1x256xi32>
    %8 = arith.cmpi slt, %4, %7 : vector<1x256xi32>
    %c1_i32_1 = arith.constant 1 : i32
    %9 = vector.broadcast %c1_i32_1 : i32 to vector<1x256xi32>
    %10 = arith.cmpi sge, %2, %9 : vector<1x256xi32>
    %c15_i32_2 = arith.constant 15 : i32
    %11 = vector.broadcast %c15_i32_2 : i32 to vector<1x256xi32>
    %12 = arith.cmpi slt, %2, %11 : vector<1x256xi32>
    %13 = arith.andi %6, %10 : vector<1x256xi1>
    %14 = arith.andi %6, %12 : vector<1x256xi1>
    %15 = arith.andi %8, %10 : vector<1x256xi1>
    %16 = arith.andi %8, %12 : vector<1x256xi1>
    %c0 = arith.constant 0 : index
    %c0_3 = arith.constant 0 : index
    %c0_4 = arith.constant 0 : index
    %17 = vector.load %arg2[%c0, %c0_3, %c0_4] : memref<9x8x4xf32, #tpu.memory_space<vmem>>, vector<1x8x4xf32>
    %18 = vector.shape_cast %17 : vector<1x8x4xf32> to vector<8x4xf32>
    %c1 = arith.constant 1 : index
    %c0_5 = arith.constant 0 : index
    %c0_6 = arith.constant 0 : index
    %19 = vector.load %arg2[%c1, %c0_5, %c0_6] : memref<9x8x4xf32, #tpu.memory_space<vmem>>, vector<1x8x4xf32>
    %20 = vector.shape_cast %19 : vector<1x8x4xf32> to vector<8x4xf32>
    %c2 = arith.constant 2 : index
    %c0_7 = arith.constant 0 : index
    %c0_8 = arith.constant 0 : index
    %21 = vector.load %arg2[%c2, %c0_7, %c0_8] : memref<9x8x4xf32, #tpu.memory_space<vmem>>, vector<1x8x4xf32>
    %22 = vector.shape_cast %21 : vector<1x8x4xf32> to vector<8x4xf32>
    %c3 = arith.constant 3 : index
    %c0_9 = arith.constant 0 : index
    %c0_10 = arith.constant 0 : index
    %23 = vector.load %arg2[%c3, %c0_9, %c0_10] : memref<9x8x4xf32, #tpu.memory_space<vmem>>, vector<1x8x4xf32>
    %24 = vector.shape_cast %23 : vector<1x8x4xf32> to vector<8x4xf32>
    %c4 = arith.constant 4 : index
    %c0_11 = arith.constant 0 : index
    %c0_12 = arith.constant 0 : index
    %25 = vector.load %arg2[%c4, %c0_11, %c0_12] : memref<9x8x4xf32, #tpu.memory_space<vmem>>, vector<1x8x4xf32>
    %26 = vector.shape_cast %25 : vector<1x8x4xf32> to vector<8x4xf32>
    %c5 = arith.constant 5 : index
    %c0_13 = arith.constant 0 : index
    %c0_14 = arith.constant 0 : index
    %27 = vector.load %arg2[%c5, %c0_13, %c0_14] : memref<9x8x4xf32, #tpu.memory_space<vmem>>, vector<1x8x4xf32>
    %28 = vector.shape_cast %27 : vector<1x8x4xf32> to vector<8x4xf32>
    %c6 = arith.constant 6 : index
    %c0_15 = arith.constant 0 : index
    %c0_16 = arith.constant 0 : index
    %29 = vector.load %arg2[%c6, %c0_15, %c0_16] : memref<9x8x4xf32, #tpu.memory_space<vmem>>, vector<1x8x4xf32>
    %30 = vector.shape_cast %29 : vector<1x8x4xf32> to vector<8x4xf32>
    %c7 = arith.constant 7 : index
    %c0_17 = arith.constant 0 : index
    %c0_18 = arith.constant 0 : index
    %31 = vector.load %arg2[%c7, %c0_17, %c0_18] : memref<9x8x4xf32, #tpu.memory_space<vmem>>, vector<1x8x4xf32>
    %32 = vector.shape_cast %31 : vector<1x8x4xf32> to vector<8x4xf32>
    %c8 = arith.constant 8 : index
    %c0_19 = arith.constant 0 : index
    %c0_20 = arith.constant 0 : index
    %33 = vector.load %arg2[%c8, %c0_19, %c0_20] : memref<9x8x4xf32, #tpu.memory_space<vmem>>, vector<1x8x4xf32>
    %34 = vector.shape_cast %33 : vector<1x8x4xf32> to vector<8x4xf32>
    %c0_21 = arith.constant 0 : index
    %c0_22 = arith.constant 0 : index
    %35 = vector.load %arg3[%c0_21, %c0_22] : memref<8x1xf32, #tpu.memory_space<vmem>>, vector<8x1xf32>
    %c0_23 = arith.constant 0 : index
    %c0_24 = arith.constant 0 : index
    %c0_25 = arith.constant 0 : index
    %36 = vector.load %arg1[%c0_23, %c0_24, %c0_25] : memref<2x4x256xf32, #tpu.memory_space<vmem>>, vector<1x4x256xf32>
    %37 = vector.shape_cast %36 : vector<1x4x256xf32> to vector<4x256xf32>
    %c17_i32 = arith.constant 17 : i32
    %38 = tpu.dynamic_rotate %37 by %c17_i32 dim 1 : vector<4x256xf32>, i32 -> vector<4x256xf32>
    %cst = arith.constant 0.000000e+00 : f32
    %39 = vector.shape_cast %13 : vector<1x256xi1> to vector<1x256xi1>
    %40 = vector.broadcast %39 : vector<1x256xi1> to vector<4x256xi1>
    %41 = vector.broadcast %cst : f32 to vector<4x256xf32>
    %42 = arith.select %40, %38, %41 : vector<4x256xi1>, vector<4x256xf32>
    %cst_26 = arith.constant dense<0.000000e+00> : vector<8x256xf32>
    %43 = tpu.matmul %18, %42, %cst_26 {dimension_numbers = #tpu.dot_dimension_numbers<[1], [0], [0], [1], [0, 0, 1, 1], [], []>} : vector<8x4xf32>, vector<4x256xf32>, vector<8x256xf32> -> vector<8x256xf32>
    %c16_i32 = arith.constant 16 : i32
    %44 = tpu.dynamic_rotate %37 by %c16_i32 dim 1 : vector<4x256xf32>, i32 -> vector<4x256xf32>
    %cst_27 = arith.constant 0.000000e+00 : f32
    %45 = vector.shape_cast %6 : vector<1x256xi1> to vector<1x256xi1>
    %46 = vector.broadcast %45 : vector<1x256xi1> to vector<4x256xi1>
    %47 = vector.broadcast %cst_27 : f32 to vector<4x256xf32>
    %48 = arith.select %46, %44, %47 : vector<4x256xi1>, vector<4x256xf32>
    %cst_28 = arith.constant dense<0.000000e+00> : vector<8x256xf32>
    %49 = tpu.matmul %20, %48, %cst_28 {dimension_numbers = #tpu.dot_dimension_numbers<[1], [0], [0], [1], [0, 0, 1, 1], [], []>} : vector<8x4xf32>, vector<4x256xf32>, vector<8x256xf32> -> vector<8x256xf32>
    %50 = arith.addf %43, %49 : vector<8x256xf32>
    %c15_i32_29 = arith.constant 15 : i32
    %51 = tpu.dynamic_rotate %37 by %c15_i32_29 dim 1 : vector<4x256xf32>, i32 -> vector<4x256xf32>
    %cst_30 = arith.constant 0.000000e+00 : f32
    %52 = vector.shape_cast %14 : vector<1x256xi1> to vector<1x256xi1>
    %53 = vector.broadcast %52 : vector<1x256xi1> to vector<4x256xi1>
    %54 = vector.broadcast %cst_30 : f32 to vector<4x256xf32>
    %55 = arith.select %53, %51, %54 : vector<4x256xi1>, vector<4x256xf32>
    %cst_31 = arith.constant dense<0.000000e+00> : vector<8x256xf32>
    %56 = tpu.matmul %22, %55, %cst_31 {dimension_numbers = #tpu.dot_dimension_numbers<[1], [0], [0], [1], [0, 0, 1, 1], [], []>} : vector<8x4xf32>, vector<4x256xf32>, vector<8x256xf32> -> vector<8x256xf32>
    %57 = arith.addf %50, %56 : vector<8x256xf32>
    %c1_i32_32 = arith.constant 1 : i32
    %58 = tpu.dynamic_rotate %37 by %c1_i32_32 dim 1 : vector<4x256xf32>, i32 -> vector<4x256xf32>
    %cst_33 = arith.constant 0.000000e+00 : f32
    %59 = vector.shape_cast %10 : vector<1x256xi1> to vector<1x256xi1>
    %60 = vector.broadcast %59 : vector<1x256xi1> to vector<4x256xi1>
    %61 = vector.broadcast %cst_33 : f32 to vector<4x256xf32>
    %62 = arith.select %60, %58, %61 : vector<4x256xi1>, vector<4x256xf32>
    %cst_34 = arith.constant dense<0.000000e+00> : vector<8x256xf32>
    %63 = tpu.matmul %24, %62, %cst_34 {dimension_numbers = #tpu.dot_dimension_numbers<[1], [0], [0], [1], [0, 0, 1, 1], [], []>} : vector<8x4xf32>, vector<4x256xf32>, vector<8x256xf32> -> vector<8x256xf32>
    %64 = arith.addf %57, %63 : vector<8x256xf32>
    %cst_35 = arith.constant dense<0.000000e+00> : vector<8x256xf32>
    %65 = tpu.matmul %26, %37, %cst_35 {dimension_numbers = #tpu.dot_dimension_numbers<[1], [0], [0], [1], [0, 0, 1, 1], [], []>} : vector<8x4xf32>, vector<4x256xf32>, vector<8x256xf32> -> vector<8x256xf32>
    %66 = arith.addf %64, %65 : vector<8x256xf32>
    %c255_i32 = arith.constant 255 : i32
    %67 = tpu.dynamic_rotate %37 by %c255_i32 dim 1 : vector<4x256xf32>, i32 -> vector<4x256xf32>
    %cst_36 = arith.constant 0.000000e+00 : f32
    %68 = vector.shape_cast %12 : vector<1x256xi1> to vector<1x256xi1>
    %69 = vector.broadcast %68 : vector<1x256xi1> to vector<4x256xi1>
    %70 = vector.broadcast %cst_36 : f32 to vector<4x256xf32>
    %71 = arith.select %69, %67, %70 : vector<4x256xi1>, vector<4x256xf32>
    %cst_37 = arith.constant dense<0.000000e+00> : vector<8x256xf32>
    %72 = tpu.matmul %28, %71, %cst_37 {dimension_numbers = #tpu.dot_dimension_numbers<[1], [0], [0], [1], [0, 0, 1, 1], [], []>} : vector<8x4xf32>, vector<4x256xf32>, vector<8x256xf32> -> vector<8x256xf32>
    %73 = arith.addf %66, %72 : vector<8x256xf32>
    %c241_i32 = arith.constant 241 : i32
    %74 = tpu.dynamic_rotate %37 by %c241_i32 dim 1 : vector<4x256xf32>, i32 -> vector<4x256xf32>
    %cst_38 = arith.constant 0.000000e+00 : f32
    %75 = vector.shape_cast %15 : vector<1x256xi1> to vector<1x256xi1>
    %76 = vector.broadcast %75 : vector<1x256xi1> to vector<4x256xi1>
    %77 = vector.broadcast %cst_38 : f32 to vector<4x256xf32>
    %78 = arith.select %76, %74, %77 : vector<4x256xi1>, vector<4x256xf32>
    %cst_39 = arith.constant dense<0.000000e+00> : vector<8x256xf32>
    %79 = tpu.matmul %30, %78, %cst_39 {dimension_numbers = #tpu.dot_dimension_numbers<[1], [0], [0], [1], [0, 0, 1, 1], [], []>} : vector<8x4xf32>, vector<4x256xf32>, vector<8x256xf32> -> vector<8x256xf32>
    %80 = arith.addf %73, %79 : vector<8x256xf32>
    %c240_i32 = arith.constant 240 : i32
    %81 = tpu.dynamic_rotate %37 by %c240_i32 dim 1 : vector<4x256xf32>, i32 -> vector<4x256xf32>
    %cst_40 = arith.constant 0.000000e+00 : f32
    %82 = vector.shape_cast %8 : vector<1x256xi1> to vector<1x256xi1>
    %83 = vector.broadcast %82 : vector<1x256xi1> to vector<4x256xi1>
    %84 = vector.broadcast %cst_40 : f32 to vector<4x256xf32>
    %85 = arith.select %83, %81, %84 : vector<4x256xi1>, vector<4x256xf32>
    %cst_41 = arith.constant dense<0.000000e+00> : vector<8x256xf32>
    %86 = tpu.matmul %32, %85, %cst_41 {dimension_numbers = #tpu.dot_dimension_numbers<[1], [0], [0], [1], [0, 0, 1, 1], [], []>} : vector<8x4xf32>, vector<4x256xf32>, vector<8x256xf32> -> vector<8x256xf32>
    %87 = arith.addf %80, %86 : vector<8x256xf32>
    %c239_i32 = arith.constant 239 : i32
    %88 = tpu.dynamic_rotate %37 by %c239_i32 dim 1 : vector<4x256xf32>, i32 -> vector<4x256xf32>
    %cst_42 = arith.constant 0.000000e+00 : f32
    %89 = vector.shape_cast %16 : vector<1x256xi1> to vector<1x256xi1>
    %90 = vector.broadcast %89 : vector<1x256xi1> to vector<4x256xi1>
    %91 = vector.broadcast %cst_42 : f32 to vector<4x256xf32>
    %92 = arith.select %90, %88, %91 : vector<4x256xi1>, vector<4x256xf32>
    %cst_43 = arith.constant dense<0.000000e+00> : vector<8x256xf32>
    %93 = tpu.matmul %34, %92, %cst_43 {dimension_numbers = #tpu.dot_dimension_numbers<[1], [0], [0], [1], [0, 0, 1, 1], [], []>} : vector<8x4xf32>, vector<4x256xf32>, vector<8x256xf32> -> vector<8x256xf32>
    %94 = arith.addf %87, %93 : vector<8x256xf32>
    %95 = vector.broadcast %35 : vector<8x1xf32> to vector<8x256xf32>
    %96 = arith.addf %94, %95 : vector<8x256xf32>
    %cst_44 = arith.constant 0.000000e+00 : f32
    %97 = vector.broadcast %cst_44 : f32 to vector<8x256xf32>
    %98 = arith.maximumf %96, %97 : vector<8x256xf32>
    %c0_45 = arith.constant 0 : index
    %c0_46 = arith.constant 0 : index
    %c0_47 = arith.constant 0 : index
    %99 = vector.load %arg4[%c0_45, %c0_46, %c0_47] : memref<2x8x256xf32, #tpu.memory_space<vmem>>, vector<1x8x256xf32>
    %100 = vector.shape_cast %99 : vector<1x8x256xf32> to vector<8x256xf32>
    %101 = vector.shape_cast %98 : vector<8x256xf32> to vector<1x8x256xf32>
    tpu.vector_store %arg4[%c0_45, %c0_46, %c0_47], %101 {strides = array<i32>} : memref<2x8x256xf32, #tpu.memory_space<vmem>>, vector<1x8x256xf32>,
    %c1_48 = arith.constant 1 : index
    %c0_49 = arith.constant 0 : index
    %c0_50 = arith.constant 0 : index
    %102 = vector.load %arg1[%c1_48, %c0_49, %c0_50] : memref<2x4x256xf32, #tpu.memory_space<vmem>>, vector<1x4x256xf32>
    %103 = vector.shape_cast %102 : vector<1x4x256xf32> to vector<4x256xf32>
    %c17_i32_51 = arith.constant 17 : i32
    %104 = tpu.dynamic_rotate %103 by %c17_i32_51 dim 1 : vector<4x256xf32>, i32 -> vector<4x256xf32>
    %cst_52 = arith.constant 0.000000e+00 : f32
    %105 = vector.shape_cast %13 : vector<1x256xi1> to vector<1x256xi1>
    %106 = vector.broadcast %105 : vector<1x256xi1> to vector<4x256xi1>
    %107 = vector.broadcast %cst_52 : f32 to vector<4x256xf32>
    %108 = arith.select %106, %104, %107 : vector<4x256xi1>, vector<4x256xf32>
    %cst_53 = arith.constant dense<0.000000e+00> : vector<8x256xf32>
    %109 = tpu.matmul %18, %108, %cst_53 {dimension_numbers = #tpu.dot_dimension_numbers<[1], [0], [0], [1], [0, 0, 1, 1], [], []>} : vector<8x4xf32>, vector<4x256xf32>, vector<8x256xf32> -> vector<8x256xf32>
    %c16_i32_54 = arith.constant 16 : i32
    %110 = tpu.dynamic_rotate %103 by %c16_i32_54 dim 1 : vector<4x256xf32>, i32 -> vector<4x256xf32>
    %cst_55 = arith.constant 0.000000e+00 : f32
    %111 = vector.shape_cast %6 : vector<1x256xi1> to vector<1x256xi1>
    %112 = vector.broadcast %111 : vector<1x256xi1> to vector<4x256xi1>
    %113 = vector.broadcast %cst_55 : f32 to vector<4x256xf32>
    %114 = arith.select %112, %110, %113 : vector<4x256xi1>, vector<4x256xf32>
    %cst_56 = arith.constant dense<0.000000e+00> : vector<8x256xf32>
    %115 = tpu.matmul %20, %114, %cst_56 {dimension_numbers = #tpu.dot_dimension_numbers<[1], [0], [0], [1], [0, 0, 1, 1], [], []>} : vector<8x4xf32>, vector<4x256xf32>, vector<8x256xf32> -> vector<8x256xf32>
    %116 = arith.addf %109, %115 : vector<8x256xf32>
    %c15_i32_57 = arith.constant 15 : i32
    %117 = tpu.dynamic_rotate %103 by %c15_i32_57 dim 1 : vector<4x256xf32>, i32 -> vector<4x256xf32>
    %cst_58 = arith.constant 0.000000e+00 : f32
    %118 = vector.shape_cast %14 : vector<1x256xi1> to vector<1x256xi1>
    %119 = vector.broadcast %118 : vector<1x256xi1> to vector<4x256xi1>
    %120 = vector.broadcast %cst_58 : f32 to vector<4x256xf32>
    %121 = arith.select %119, %117, %120 : vector<4x256xi1>, vector<4x256xf32>
    %cst_59 = arith.constant dense<0.000000e+00> : vector<8x256xf32>
    %122 = tpu.matmul %22, %121, %cst_59 {dimension_numbers = #tpu.dot_dimension_numbers<[1], [0], [0], [1], [0, 0, 1, 1], [], []>} : vector<8x4xf32>, vector<4x256xf32>, vector<8x256xf32> -> vector<8x256xf32>
    %123 = arith.addf %116, %122 : vector<8x256xf32>
    %c1_i32_60 = arith.constant 1 : i32
    %124 = tpu.dynamic_rotate %103 by %c1_i32_60 dim 1 : vector<4x256xf32>, i32 -> vector<4x256xf32>
    %cst_61 = arith.constant 0.000000e+00 : f32
    %125 = vector.shape_cast %10 : vector<1x256xi1> to vector<1x256xi1>
    %126 = vector.broadcast %125 : vector<1x256xi1> to vector<4x256xi1>
    %127 = vector.broadcast %cst_61 : f32 to vector<4x256xf32>
    %128 = arith.select %126, %124, %127 : vector<4x256xi1>, vector<4x256xf32>
    %cst_62 = arith.constant dense<0.000000e+00> : vector<8x256xf32>
    %129 = tpu.matmul %24, %128, %cst_62 {dimension_numbers = #tpu.dot_dimension_numbers<[1], [0], [0], [1], [0, 0, 1, 1], [], []>} : vector<8x4xf32>, vector<4x256xf32>, vector<8x256xf32> -> vector<8x256xf32>
    %130 = arith.addf %123, %129 : vector<8x256xf32>
    %cst_63 = arith.constant dense<0.000000e+00> : vector<8x256xf32>
    %131 = tpu.matmul %26, %103, %cst_63 {dimension_numbers = #tpu.dot_dimension_numbers<[1], [0], [0], [1], [0, 0, 1, 1], [], []>} : vector<8x4xf32>, vector<4x256xf32>, vector<8x256xf32> -> vector<8x256xf32>
    %132 = arith.addf %130, %131 : vector<8x256xf32>
    %c255_i32_64 = arith.constant 255 : i32
    %133 = tpu.dynamic_rotate %103 by %c255_i32_64 dim 1 : vector<4x256xf32>, i32 -> vector<4x256xf32>
    %cst_65 = arith.constant 0.000000e+00 : f32
    %134 = vector.shape_cast %12 : vector<1x256xi1> to vector<1x256xi1>
    %135 = vector.broadcast %134 : vector<1x256xi1> to vector<4x256xi1>
    %136 = vector.broadcast %cst_65 : f32 to vector<4x256xf32>
    %137 = arith.select %135, %133, %136 : vector<4x256xi1>, vector<4x256xf32>
    %cst_66 = arith.constant dense<0.000000e+00> : vector<8x256xf32>
    %138 = tpu.matmul %28, %137, %cst_66 {dimension_numbers = #tpu.dot_dimension_numbers<[1], [0], [0], [1], [0, 0, 1, 1], [], []>} : vector<8x4xf32>, vector<4x256xf32>, vector<8x256xf32> -> vector<8x256xf32>
    %139 = arith.addf %132, %138 : vector<8x256xf32>
    %c241_i32_67 = arith.constant 241 : i32
    %140 = tpu.dynamic_rotate %103 by %c241_i32_67 dim 1 : vector<4x256xf32>, i32 -> vector<4x256xf32>
    %cst_68 = arith.constant 0.000000e+00 : f32
    %141 = vector.shape_cast %15 : vector<1x256xi1> to vector<1x256xi1>
    %142 = vector.broadcast %141 : vector<1x256xi1> to vector<4x256xi1>
    %143 = vector.broadcast %cst_68 : f32 to vector<4x256xf32>
    %144 = arith.select %142, %140, %143 : vector<4x256xi1>, vector<4x256xf32>
    %cst_69 = arith.constant dense<0.000000e+00> : vector<8x256xf32>
    %145 = tpu.matmul %30, %144, %cst_69 {dimension_numbers = #tpu.dot_dimension_numbers<[1], [0], [0], [1], [0, 0, 1, 1], [], []>} : vector<8x4xf32>, vector<4x256xf32>, vector<8x256xf32> -> vector<8x256xf32>
    %146 = arith.addf %139, %145 : vector<8x256xf32>
    %c240_i32_70 = arith.constant 240 : i32
    %147 = tpu.dynamic_rotate %103 by %c240_i32_70 dim 1 : vector<4x256xf32>, i32 -> vector<4x256xf32>
    %cst_71 = arith.constant 0.000000e+00 : f32
    %148 = vector.shape_cast %8 : vector<1x256xi1> to vector<1x256xi1>
    %149 = vector.broadcast %148 : vector<1x256xi1> to vector<4x256xi1>
    %150 = vector.broadcast %cst_71 : f32 to vector<4x256xf32>
    %151 = arith.select %149, %147, %150 : vector<4x256xi1>, vector<4x256xf32>
    %cst_72 = arith.constant dense<0.000000e+00> : vector<8x256xf32>
    %152 = tpu.matmul %32, %151, %cst_72 {dimension_numbers = #tpu.dot_dimension_numbers<[1], [0], [0], [1], [0, 0, 1, 1], [], []>} : vector<8x4xf32>, vector<4x256xf32>, vector<8x256xf32> -> vector<8x256xf32>
    %153 = arith.addf %146, %152 : vector<8x256xf32>
    %c239_i32_73 = arith.constant 239 : i32
    %154 = tpu.dynamic_rotate %103 by %c239_i32_73 dim 1 : vector<4x256xf32>, i32 -> vector<4x256xf32>
    %cst_74 = arith.constant 0.000000e+00 : f32
    %155 = vector.shape_cast %16 : vector<1x256xi1> to vector<1x256xi1>
    %156 = vector.broadcast %155 : vector<1x256xi1> to vector<4x256xi1>
    %157 = vector.broadcast %cst_74 : f32 to vector<4x256xf32>
    %158 = arith.select %156, %154, %157 : vector<4x256xi1>, vector<4x256xf32>
    %cst_75 = arith.constant dense<0.000000e+00> : vector<8x256xf32>
    %159 = tpu.matmul %34, %158, %cst_75 {dimension_numbers = #tpu.dot_dimension_numbers<[1], [0], [0], [1], [0, 0, 1, 1], [], []>} : vector<8x4xf32>, vector<4x256xf32>, vector<8x256xf32> -> vector<8x256xf32>
    %160 = arith.addf %153, %159 : vector<8x256xf32>
    %161 = vector.broadcast %35 : vector<8x1xf32> to vector<8x256xf32>
    %162 = arith.addf %160, %161 : vector<8x256xf32>
    %cst_76 = arith.constant 0.000000e+00 : f32
    %163 = vector.broadcast %cst_76 : f32 to vector<8x256xf32>
    %164 = arith.maximumf %162, %163 : vector<8x256xf32>
    %c1_77 = arith.constant 1 : index
    %c0_78 = arith.constant 0 : index
    %c0_79 = arith.constant 0 : index
    %165 = vector.load %arg4[%c1_77, %c0_78, %c0_79] : memref<2x8x256xf32, #tpu.memory_space<vmem>>, vector<1x8x256xf32>
    %166 = vector.shape_cast %165 : vector<1x8x256xf32> to vector<8x256xf32>
    %167 = vector.shape_cast %164 : vector<8x256xf32> to vector<1x8x256xf32>
    tpu.vector_store %arg4[%c1_77, %c0_78, %c0_79], %167 {strides = array<i32>} : memref<2x8x256xf32, #tpu.memory_space<vmem>>, vector<1x8x256xf32>,
    return
  }
  func.func @transform_0(%arg0: i32) -> (i32, i32, i32) {
    %c0_i32 = arith.constant 0 : i32
    %c0_i32_0 = arith.constant 0 : i32
    %c0_i32_1 = arith.constant 0 : i32
    return %arg0, %c0_i32, %c0_i32_0 : i32, i32, i32
  }
  func.func @transform_1(%arg0: i32) -> (i32, i32, i32) {
    %c0_i32 = arith.constant 0 : i32
    %c0_i32_0 = arith.constant 0 : i32
    %c0_i32_1 = arith.constant 0 : i32
    %c0_i32_2 = arith.constant 0 : i32
    return %c0_i32, %c0_i32_0, %c0_i32_1 : i32, i32, i32
  }
  func.func @transform_2(%arg0: i32) -> (i32, i32) {
    %c0_i32 = arith.constant 0 : i32
    %c0_i32_0 = arith.constant 0 : i32
    %c0_i32_1 = arith.constant 0 : i32
    return %c0_i32, %c0_i32_0 : i32, i32
  }
  func.func @transform_3(%arg0: i32) -> (i32, i32, i32) {
    %c0_i32 = arith.constant 0 : i32
    %c0_i32_0 = arith.constant 0 : i32
    %c0_i32_1 = arith.constant 0 : i32
    return %arg0, %c0_i32, %c0_i32_0 : i32, i32, i32
  }
}

</mosaic_0001>

<bundles_post_ra>
// kernel: tpu_custom_call.1
= control target key start
LH: loop header
LB: loop body
LE: loop exit
PB: predicated region body
PF: predicated region fallthrough
CT: control target
= control target key end

     0   :  { %s1840_s16 = smov 16   ;;  %s2282_s0 = inlined_call_operand.vmem [shape: f32[2,4,256], index: 0, kind: input, shape index: {}]   ;;  %s2283_s1 = inlined_call_operand.vmem [shape: f32[9,8,4], index: 1, kind: input, shape index: {}]   ;;  %s2284_s2 = inlined_call_operand.vmem [shape: f32[8,1], index: 2, kind: input, shape index: {}]   ;;  %s2285_s3 = inlined_call_operand.hbm [shape: f32[2,8,256], index: 3, kind: output, shape index: {}]  }
   0x1   :  { %v1875_v0 = vld [vmem:[%s2282_s0 + $0x8] sm:$0xff]  ;;  %v1880_v1 = vld [vmem:[%s2282_s0] sm:$0xff] }
   0x2   :  { %922 = vrot.lane.b32.xlu1 %v1875_v0, %s1840_s16  ;;  %73 = vrot.lane.b32.xlu0 %v1880_v1, %s1840_s16  ;;  %v1888_v2 = vcombine.high %v1875_v0, %v1875_v0  ;;  %v1892_v3 = vcombine.high %v1880_v1, %v1880_v1 }
   0x3   :  { %8 = vsyncpa [#allocation3], 0  ;;  %v1841_v4 = vmov 0.0   ;;  %s1842_s0 = smov 17   ;;  %s1843_s17 = smov 15   ;;  %v1849_v5 = vmov 0   ;;  %v15_v7 = vlaneseq }
   0x4   :  { %161 = vmatprep.mubr.f32.mxu0 %v1841_v4  ;;  %1000 = vmatprep.mubr.f32.mxu1 %v1841_v4  ;;  %s1844_s18 = smov 1   ;;  %s1845_s19 = smov 127   ;;  %v55_v6 = vld [vmem:[%s2284_s2] sm:$0xff]  ;;  %vm90_vm4 = vcmask 1043456   ;;  %vm86_vm7 = vcmask 31744   ;;  %v1706_v30 = vld [vmem:[%s2283_s1 + $0x8] sm:$0xff] }
   0x5   :  { %s1846_s20 = smov 113   ;;  %s1847_s21 = smov 112   ;;  %1813 = vset.pattern.permute.xlu0 %v1849_v5  ;;  %v1931_v8 = vand.u32 127, %v15_v7  ;;  %v38_v45 = vld [vmem:[%s2283_s1] sm:$0xff]  ;;  %v1707_v58 = vld [vmem:[%s2283_s1 + $0x10] sm:$0xff]  ;;  %v1708_v16 = vld [vmem:[%s2283_s1 + $0x18] sm:$0xff] }
   0x6   :  { %924 = vrot.lane.b32.xlu1 %v1888_v2, %s1840_s16  ;;  %75 = vrot.lane.b32.xlu0 %v1892_v3, %s1840_s16  ;;  %s1848_s22 = smov 111   ;;  %v1710_v18 = vld [vmem:[%s2283_s1 + $0x28] sm:$0xff]  ;;  %v1712_v37 = vld [vmem:[%s2283_s1 + $0x38] sm:$0xff]  ;;  %s1850_s15 = smov [#allocation2]  }
   0x7   :  { %v1934_v9 = vadd.s32 128, %v1931_v8  ;;  %v18_v11 = vand.u32 15, %v1931_v8  ;;  %v20_v12 = vshra.s32 %v1931_v8, 4  ;;  %vm77_vm0 = vcmp.lt.s32.totalorder %v1931_v8, 16 }
   0x8   :  { %vm64_vm6 = vcmp.lt.s32.totalorder %v1931_v8, 17  ;;  %vm252_vm13 = vcmp.lt.s32.totalorder %v1931_v8, 15  ;;  %vm347_vm15 = vcmp.lt.s32.totalorder %v1931_v8, 1 }
   0x9   :  { %v21_v10 = vshra.s32 %v1934_v9, 4  ;;  %v19_v15 = vand.u32 15, %v1934_v9  ;;  %vm1949_vm2 = vcmp.ge.s32.totalorder %v20_v12, 1  ;;  %vm1953_vm3 = vcmp.ge.s32.totalorder %v18_v11, 1 }
   0xa   :  { %62 = vrot.lane.b32.xlu1 %v1892_v3, %s1842_s0  ;;  %60 = vrot.lane.b32.xlu0 %v1880_v1, %s1842_s0  ;;  %vm30_vm8 = vmand %vm1949_vm2, %vm1953_vm3  ;;  %vm2004_vm10 = vcmp.lt.s32.totalorder %v18_v11, 15 }
   0xb   :  { %vm1943_vm1 = vcmp.ge.s32.totalorder %v21_v10, 1  ;;  %vm1957_vm5 = vcmp.ge.s32.totalorder %v19_v15, 1  ;;  %vm2009_vm11 = vcmp.lt.s32.totalorder %v19_v15, 15  ;;  %vm32_vm12 = vmand %vm1949_vm2, %vm2004_vm10 }
   0xc   :  { %vm31_vm9 = vmand %vm1943_vm1, %vm1957_vm5 }
   0xd   :  { %vm33_vm14 = vmand %vm1943_vm1, %vm2009_vm11 }
   0xe   :  { %916 = vrot.lane.b32.xlu1 %v1888_v2, %s1842_s0  ;;  %914 = vrot.lane.b32.xlu0 %v1875_v0, %s1842_s0  ;;  %s1695_s0 = sshll.u32 %s1850_s15, 4  ;;  %s1696_s0 = int_to_ptr.vmem [resolvable:$true] %s1695_s0 }
   0xf   :  { %p1821_p1 = scmp.lt.s32.totalorder %s1696_s0, %s1696_s0 }
  0x12   :  { %250 = vrot.lane.b32.xlu1 %v1892_v3, %s1843_s17  ;;  %248 = vrot.lane.b32.xlu0 %v1880_v1, %s1843_s17 }
  0x16   :  { %1086 = vrot.lane.b32.xlu1 %v1888_v2, %s1843_s17  ;;  %1084 = vrot.lane.b32.xlu0 %v1875_v0, %s1843_s17 }
  0x1a   :  { %345 = vrot.lane.b32.xlu1 %v1892_v3, %s1844_s18  ;;  %343 = vrot.lane.b32.xlu0 %v1880_v1, %s1844_s18 }
  0x1e   :  { %1173 = vrot.lane.b32.xlu1 %v1888_v2, %s1844_s18  ;;  %1171 = vrot.lane.b32.xlu0 %v1875_v0, %s1844_s18 }
  0x22   :  { %520 = vrot.lane.b32.xlu1 %v1892_v3, %s1845_s19  ;;  %518 = vrot.lane.b32.xlu0 %v1880_v1, %s1845_s19 }
  0x26   :  { %1337 = vrot.lane.b32.xlu1 %v1888_v2, %s1845_s19  ;;  %1335 = vrot.lane.b32.xlu0 %v1875_v0, %s1845_s19 }
  0x2a   :  { %615 = vrot.lane.b32.xlu1 %v1892_v3, %s1846_s20  ;;  %613 = vrot.lane.b32.xlu0 %v1880_v1, %s1846_s20 }
  0x2e   :  { %1424 = vrot.lane.b32.xlu1 %v1888_v2, %s1846_s20  ;;  %1422 = vrot.lane.b32.xlu0 %v1875_v0, %s1846_s20 }
  0x32   :  { %710 = vrot.lane.b32.xlu1 %v1892_v3, %s1847_s21  ;;  %708 = vrot.lane.b32.xlu0 %v1880_v1, %s1847_s21 }
  0x36   :  { %1511 = vrot.lane.b32.xlu1 %v1888_v2, %s1847_s21  ;;  %1509 = vrot.lane.b32.xlu0 %v1875_v0, %s1847_s21 }
  0x3a   :  { %805 = vrot.lane.b32.xlu1 %v1892_v3, %s1848_s22  ;;  %803 = vrot.lane.b32.xlu0 %v1880_v1, %s1848_s22 }
  0x3e   :  { %1598 = vrot.lane.b32.xlu1 %v1888_v2, %s1848_s22  ;;  %1596 = vrot.lane.b32.xlu0 %v1875_v0, %s1848_s22 }
  0x42   :  { %900 = vperm.xlu0 %1813, %v55_v6  }
  0x74   :  { %v923_v13 = vpop.permute.xlu1 %922  ;;  %v74_v14 = vpop.permute.xlu0 %73 }
  0x78   :  { %v925_v19 = vpop.permute.xlu1 %924  ;;  %v76_v20 = vpop.permute.xlu0 %75 }
  0x79   :  { %v927_v22 = vsel %vm77_vm0, %v925_v19, %v923_v13  ;;  %v79_v23 = vsel %vm77_vm0, %v76_v20, %v74_v14  ;;  %v78_v24 = vsel %vm77_vm0, %v74_v14, %v76_v20  ;;  %v926_v25 = vsel %vm77_vm0, %v923_v13, %v925_v19 }
  0x7a   :  { %v85_v26 = vsel %vm1943_vm1, %v78_v24, 0.0  ;;  %v929_v27 = vsel %vm1943_vm1, %v926_v25, 0.0  ;;  %v84_v28 = vsel %vm1949_vm2, %v79_v23, 0.0  ;;  %v928_v29 = vsel %vm1949_vm2, %v927_v22, 0.0  ;;  %v1709_v25 = vld [vmem:[%s2283_s1 + $0x20] sm:$0xff] }
  0x7b   :  { %1714 = vmatprep.subr.msk.mxu0 %vm90_vm4, %v85_v26  ;;  %1742 = vmatprep.subr.msk.mxu1 %vm90_vm4, %v929_v27  ;;  %vm522_vm0 = vcmp.lt.s32.totalorder %v1931_v8, 127  ;;  %vm2130_vm1 = vcmp.lt.s32.totalorder %v21_v10, 15  ;;  %vm617_vm2 = vcmp.lt.s32.totalorder %v1931_v8, 113 }
  0x7c   :  { %v63_v31 = vpop.permute.xlu1 %62  ;;  %v61_v32 = vpop.permute.xlu0 %60  ;;  %1715 = vmatpush1.msk.msra.mxu0 %vm90_vm4, %v84_v28  ;;  %1743 = vmatpush1.msk.msra.mxu1 %vm90_vm4, %v928_v29 }
  0x7d   :  { %v65_v33 = vsel %vm64_vm6, %v61_v32, %v63_v31  ;;  %v66_v34 = vsel %vm64_vm6, %v63_v31, %v61_v32  ;;  %1716 = vmatmul.mubr.msk.f32.vlgmr.msra.gmra.mrb[0].mxu0 %vm86_vm7, %v1706_v30  ;;  %1744 = vmatmul.mubr.msk.f32.vlgmr.msra.gmra.mrb[0].mxu1 %vm86_vm7, %v1706_v30 }
  0x7e   :  { %v71_v35 = vsel %vm30_vm8, %v66_v34, 0.0  ;;  %v72_v36 = vsel %vm31_vm9, %v65_v33, 0.0  ;;  %241 = vmatprep.mubr.f32.mxu0 %v1841_v4  ;;  %1077 = vmatprep.mubr.f32.mxu1 %v1841_v4 }
  0x7f   :  { %1717 = vmatprep.subr.msk.mxu0 %vm90_vm4, %v72_v36 }
  0x80   :  { %v917_v38 = vpop.permute.xlu1 %916  ;;  %v915_v39 = vpop.permute.xlu0 %914  ;;  %1718 = vmatpush1.msk.msra.mxu0 %vm90_vm4, %v71_v35 }
  0x81   :  { %v918_v41 = vsel %vm64_vm6, %v915_v39, %v917_v38  ;;  %v919_v42 = vsel %vm64_vm6, %v917_v38, %v915_v39  ;;  %vm35_vm6 = vmand %vm2130_vm1, %vm1957_vm5 }
  0x82   :  { %v920_v43 = vsel %vm30_vm8, %v919_v42, 0.0  ;;  %v921_v44 = vsel %vm31_vm9, %v918_v41, 0.0  ;;  %vm2157_vm8 = vcmp.lt.s32.totalorder %v20_v12, 15 }
  0x83   :  { %1745 = vmatprep.subr.msk.mxu1 %vm90_vm4, %v921_v44  ;;  %vm34_vm9 = vmand %vm2157_vm8, %vm1953_vm3 }
  0x84   :  { %v251_v46 = vpop.permute.xlu1 %250  ;;  %v249_v47 = vpop.permute.xlu0 %248  ;;  %1746 = vmatpush1.msk.msra.mxu1 %vm90_vm4, %v920_v43 }
  0x85   :  { %v253_v48 = vsel %vm252_vm13, %v249_v47, %v251_v46  ;;  %v254_v49 = vsel %vm252_vm13, %v251_v46, %v249_v47  ;;  %1719 = vmatmul.mubr.msk.f32.vlgmr.msra.gmra.mrb[0].mxu0 %vm86_vm7, %v38_v45  ;;  %1747 = vmatmul.mubr.msk.f32.vlgmr.msra.gmra.mrb[0].mxu1 %vm86_vm7, %v38_v45 }
  0x86   :  { %v259_v50 = vsel %vm32_vm12, %v254_v49, 0.0  ;;  %v260_v51 = vsel %vm33_vm14, %v253_v48, 0.0  ;;  %334 = vmatprep.mubr.f32.mxu0 %v1841_v4  ;;  %1162 = vmatprep.mubr.f32.mxu1 %v1841_v4  ;;  %v1711_v49 = vld [vmem:[%s2283_s1 + $0x30] sm:$0xff] }
  0x87   :  { %1720 = vmatprep.subr.msk.mxu0 %vm90_vm4, %v260_v51 }
  0x88   :  { %v1087_v52 = vpop.permute.xlu1 %1086  ;;  %v1085_v53 = vpop.permute.xlu0 %1084  ;;  %1721 = vmatpush1.msk.msra.mxu0 %vm90_vm4, %v259_v50 }
  0x89   :  { %v1088_v54 = vsel %vm252_vm13, %v1085_v53, %v1087_v52  ;;  %v1089_v55 = vsel %vm252_vm13, %v1087_v52, %v1085_v53  ;;  %vm36_vm13 = vmand %vm2157_vm8, %vm2004_vm10 }
  0x8a   :  { %v1090_v56 = vsel %vm32_vm12, %v1089_v55, 0.0  ;;  %v1091_v57 = vsel %vm33_vm14, %v1088_v54, 0.0  ;;  %vm37_vm12 = vmand %vm2130_vm1, %vm2009_vm11 }
  0x8b   :  { %1748 = vmatprep.subr.msk.mxu1 %vm90_vm4, %v1091_v57 }
  0x8c   :  { %v346_v59 = vpop.permute.xlu1 %345  ;;  %v344_v60 = vpop.permute.xlu0 %343  ;;  %1749 = vmatpush1.msk.msra.mxu1 %vm90_vm4, %v1090_v56 }
  0x8d   :  { %v348_v61 = vsel %vm347_vm15, %v344_v60, %v346_v59  ;;  %v349_v62 = vsel %vm347_vm15, %v346_v59, %v344_v60  ;;  %1722 = vmatmul.mubr.msk.f32.vlgmr.msra.gmra.mrb[0].mxu0 %vm86_vm7, %v1707_v58  ;;  %1750 = vmatmul.mubr.msk.f32.vlgmr.msra.gmra.mrb[0].mxu1 %vm86_vm7, %v1707_v58 }
  0x8e   :  { %v354_v63 = vsel %vm1953_vm3, %v349_v62, 0.0  ;;  %v355_v5 = vsel %vm1957_vm5, %v348_v61, 0.0  ;;  %429 = vmatprep.mubr.f32.mxu0 %v1841_v4  ;;  %1249 = vmatprep.mubr.f32.mxu1 %v1841_v4 }
  0x8f   :  { %1723 = vmatprep.subr.msk.mxu0 %vm90_vm4, %v355_v5 }
  0x90   :  { %v1174_v6 = vpop.permute.xlu1 %1173  ;;  %v1172_v7 = vpop.permute.xlu0 %1171  ;;  %1724 = vmatpush1.msk.msra.mxu0 %vm90_vm4, %v354_v63 }
  0x91   :  { %v1175_v11 = vsel %vm347_vm15, %v1172_v7, %v1174_v6  ;;  %v1176_v13 = vsel %vm347_vm15, %v1174_v6, %v1172_v7  ;;  %1726 = vmatprep.subr.msk.mxu0 %vm90_vm4, %v1892_v3 }
  0x92   :  { %v1177_v14 = vsel %vm1953_vm3, %v1176_v13, 0.0  ;;  %v1178_v15 = vsel %vm1957_vm5, %v1175_v11, 0.0  ;;  %vm712_vm3 = vcmp.lt.s32.totalorder %v1931_v8, 112  ;;  %vm807_vm5 = vcmp.lt.s32.totalorder %v1931_v8, 111  ;;  %v1713_v8 = vld [vmem:[%s2283_s1 + $0x40] sm:$0xff]  ;;  %s1816_s1 = scalar_lea.vmem %s1696_s0, 512 }
  0x93   :  { %1751 = vmatprep.subr.msk.mxu1 %vm90_vm4, %v1178_v15  ;;  %p1817_p0 = scmp.ne.s32.totalorder %s1696_s0, %s1816_s1  ;;  %p1822_p2 = scmp.lt.s32.totalorder %s1816_s1, %s1816_s1 }
  0x94   :  { %1752 = vmatpush1.msk.msra.mxu1 %vm90_vm4, %v1177_v14  ;;  %v521_v17 = vpop.permute.xlu1 %520  ;;  %v519_v19 = vpop.permute.xlu0 %518 }
  0x95   :  { %1725 = vmatmul.mubr.msk.f32.vlgmr.msra.gmra.mrb[0].mxu0 %vm86_vm7, %v1708_v16  ;;  %1753 = vmatmul.mubr.msk.f32.vlgmr.msra.gmra.mrb[0].mxu1 %vm86_vm7, %v1708_v16  ;;  %v524_v3 = vsel %vm522_vm0, %v521_v17, %v519_v19  ;;  %v523_v22 = vsel %vm522_vm0, %v519_v19, %v521_v17  ;;  %p1823_p3 = por %p1822_p2, %p1821_p1 }
  0x96   :  { %v530_v20 = vsel %vm2009_vm11, %v524_v3, 0.0  ;;  %1754 = vmatprep.subr.msk.mxu1 %vm90_vm4, %v1888_v2  ;;  %1727 = vmatpush1.msk.msra.mxu0 %vm90_vm4, %v1880_v1  ;;  %v529_v9 = vsel %vm2004_vm10, %v523_v22, 0.0 }
  0x97   :  { %509 = vmatprep.mubr.f32.mxu0 %v1841_v4  ;;  %1755 = vmatpush1.msk.msra.mxu1 %vm90_vm4, %v1875_v0  ;;  %p1824_p4 = pnand %p1823_p3, %p1817_p0 }
  0x98   :  { %1326 = vmatprep.mubr.f32.mxu1 %v1841_v4  ;;  %1729 = vmatprep.subr.msk.mxu0 %vm90_vm4, %v530_v20  ;;  %v1338_v23 = vpop.permute.xlu1 %1337  ;;  %v1336_v24 = vpop.permute.xlu0 %1335 }
  0x99   :  { %v1339_v1 = vsel %vm522_vm0, %v1336_v24, %v1338_v23  ;;  %v1340_v0 = vsel %vm522_vm0, %v1338_v23, %v1336_v24 }
  0x9a   :  { %v1342_v26 = vsel %vm2009_vm11, %v1340_v0, 0.0  ;;  %v1341_v10 = vsel %vm2004_vm10, %v1339_v1, 0.0 }
  0x9b   :  { %1757 = vmatprep.subr.msk.mxu1 %vm90_vm4, %v1342_v26 }
  0x9c   :  { %v616_v27 = vpop.permute.xlu1 %615  ;;  %v614_v28 = vpop.permute.xlu0 %613 }
  0x9d   :  { %1728 = vmatmul.mubr.msk.f32.vlgmr.msra.gmra.mrb[0].mxu0 %vm86_vm7, %v1709_v25  ;;  %1756 = vmatmul.mubr.msk.f32.vlgmr.msra.gmra.mrb[0].mxu1 %vm86_vm7, %v1709_v25  ;;  %v619_v30 = vsel %vm617_vm2, %v616_v27, %v614_v28  ;;  %v618_v12 = vsel %vm617_vm2, %v614_v28, %v616_v27 }
  0x9e   :  { %1730 = vmatpush1.msk.msra.mxu0 %vm90_vm4, %v529_v9  ;;  %v625_v31 = vsel %vm35_vm6, %v619_v30, 0.0  ;;  %1758 = vmatpush1.msk.msra.mxu1 %vm90_vm4, %v1341_v10  ;;  %v624_v38 = vsel %vm34_vm9, %v618_v12, 0.0 }
  0x9f   :  { %604 = vmatprep.mubr.f32.mxu0 %v1841_v4  ;;  %1413 = vmatprep.mubr.f32.mxu1 %v1841_v4 }
  0xa0   :  { %1732 = vmatprep.subr.msk.mxu0 %vm90_vm4, %v625_v31  ;;  %v1425_v32 = vpop.permute.xlu1 %1424  ;;  %v1423_v33 = vpop.permute.xlu0 %1422 }
  0xa1   :  { %v1426_v34 = vsel %vm617_vm2, %v1423_v33, %v1425_v32  ;;  %v1427_v35 = vsel %vm617_vm2, %v1425_v32, %v1423_v33 }
  0xa2   :  { %v1429_v36 = vsel %vm35_vm6, %v1427_v35, 0.0  ;;  %v1428_v39 = vsel %vm34_vm9, %v1426_v34, 0.0 }
  0xa3   :  { %1760 = vmatprep.subr.msk.mxu1 %vm90_vm4, %v1429_v36 }
  0xa4   :  { %v711_v41 = vpop.permute.xlu1 %710  ;;  %v709_v42 = vpop.permute.xlu0 %708 }
  0xa5   :  { %1731 = vmatmul.mubr.msk.f32.vlgmr.msra.gmra.mrb[0].mxu0 %vm86_vm7, %v1710_v18  ;;  %1759 = vmatmul.mubr.msk.f32.vlgmr.msra.gmra.mrb[0].mxu1 %vm86_vm7, %v1710_v18  ;;  %v714_v43 = vsel %vm712_vm3, %v711_v41, %v709_v42  ;;  %v713_v44 = vsel %vm712_vm3, %v709_v42, %v711_v41 }
  0xa6   :  { %1733 = vmatpush1.msk.msra.mxu0 %vm90_vm4, %v624_v38  ;;  %v720_v21 = vsel %vm2130_vm1, %v714_v43, 0.0  ;;  %1761 = vmatpush1.msk.msra.mxu1 %vm90_vm4, %v1428_v39  ;;  %v719_v51 = vsel %vm2157_vm8, %v713_v44, 0.0 }
  0xa7   :  { %699 = vmatprep.mubr.f32.mxu0 %v1841_v4  ;;  %1500 = vmatprep.mubr.f32.mxu1 %v1841_v4 }
  0xa8   :  { %1735 = vmatprep.subr.msk.mxu0 %vm90_vm4, %v720_v21  ;;  %v1512_v45 = vpop.permute.xlu1 %1511  ;;  %v1510_v46 = vpop.permute.xlu0 %1509 }
  0xa9   :  { %v1513_v47 = vsel %vm712_vm3, %v1510_v46, %v1512_v45  ;;  %v1514_v48 = vsel %vm712_vm3, %v1512_v45, %v1510_v46 }
  0xaa   :  { %v1516_v50 = vsel %vm2130_vm1, %v1514_v48, 0.0  ;;  %v1515_v52 = vsel %vm2157_vm8, %v1513_v47, 0.0 }
  0xab   :  { %1763 = vmatprep.subr.msk.mxu1 %vm90_vm4, %v1516_v50 }
  0xac   :  { %v806_v53 = vpop.permute.xlu1 %805  ;;  %v804_v54 = vpop.permute.xlu0 %803 }
  0xad   :  { %1734 = vmatmul.mubr.msk.f32.vlgmr.msra.gmra.mrb[0].mxu0 %vm86_vm7, %v1711_v49  ;;  %1762 = vmatmul.mubr.msk.f32.vlgmr.msra.gmra.mrb[0].mxu1 %vm86_vm7, %v1711_v49  ;;  %v809_v55 = vsel %vm807_vm5, %v806_v53, %v804_v54  ;;  %v808_v57 = vsel %vm807_vm5, %v804_v54, %v806_v53 }
  0xae   :  { %1736 = vmatpush1.msk.msra.mxu0 %vm90_vm4, %v719_v51  ;;  %v815_v56 = vsel %vm37_vm12, %v809_v55, 0.0  ;;  %1764 = vmatpush1.msk.msra.mxu1 %vm90_vm4, %v1515_v52  ;;  %v814_v63 = vsel %vm36_vm13, %v808_v57, 0.0 }
  0xaf   :  { %794 = vmatprep.mubr.f32.mxu0 %v1841_v4  ;;  %1587 = vmatprep.mubr.f32.mxu1 %v1841_v4 }
  0xb0   :  { %1738 = vmatprep.subr.msk.mxu0 %vm90_vm4, %v815_v56  ;;  %v1599_v58 = vpop.permute.xlu1 %1598  ;;  %v1597_v59 = vpop.permute.xlu0 %1596 }
  0xb1   :  { %v1600_v60 = vsel %vm807_vm5, %v1597_v59, %v1599_v58  ;;  %v1601_v61 = vsel %vm807_vm5, %v1599_v58, %v1597_v59 }
  0xb2   :  { %v1603_v62 = vsel %vm37_vm12, %v1601_v61, 0.0  ;;  %v1602_v5 = vsel %vm36_vm13, %v1600_v60, 0.0 }
  0xb3   :  { %1766 = vmatprep.subr.msk.mxu1 %vm90_vm4, %v1603_v62 }
  0xb5   :  { %1737 = vmatmul.mubr.msk.f32.vlgmr.msra.gmra.mrb[0].mxu0 %vm86_vm7, %v1712_v37  ;;  %1765 = vmatmul.mubr.msk.f32.vlgmr.msra.gmra.mrb[0].mxu1 %vm86_vm7, %v1712_v37 }
  0xb6   :  { %1739 = vmatpush1.msk.msra.mxu0 %vm90_vm4, %v814_v63  ;;  %1767 = vmatpush1.msk.msra.mxu1 %vm90_vm4, %v1602_v5 }
  0xb7   :  { %889 = vmatprep.mubr.f32.mxu0 %v1841_v4  ;;  %1674 = vmatprep.mubr.f32.mxu1 %v1841_v4 }
  0xbd   :  { %1740 = vmatmul.mubr.msk.f32.vlgmr.msra.gmra.mrb[0].mxu0 %vm86_vm7, %v1713_v8  ;;  %1768 = vmatmul.mubr.msk.f32.vlgmr.msra.gmra.mrb[0].mxu1 %vm86_vm7, %v1713_v8 }
  0xc1   :  { %v901_v40 = vpop.permute.xlu0 %900 }
 0x190   :  { %v891_v6 = vpop.f32.mrb[0].mxu0  ;;  %v1676_v7 = vpop.f32.mrb[0].mxu1 }
 0x191   :  { %v903_v11 = vadd.f32 %v901_v40, %v891_v6  ;;  %v1683_v13 = vadd.f32 %v1676_v7, %v901_v40  ;;  %v893_v14 = vpop.f32.mrb[1].mxu0  ;;  %v1678_v15 = vpop.f32.mrb[1].mxu1 }
 0x192   :  { %v904_v16 = vadd.f32 %v901_v40, %v893_v14  ;;  %v1684_v17 = vadd.f32 %v1678_v15, %v901_v40 }
 0x193   :  { %v905_v4 = vmax.f32 %v903_v11, 0.0  ;;  %v1685_v19 = vmax.f32 %v1683_v13, 0.0 }
 0x194   :  { %v906_v3 = vmax.f32 %v904_v16, 0.0  ;;  %v1686_v20 = vmax.f32 %v1684_v17, 0.0 }
 0x195   :  { %907 = vst [vmem:[#allocation2] sm:$0xff] %v905_v4  ;;  %1688 = vst [vmem:[#allocation2 + $0x10] sm:$0xff] %v1685_v19 }
 0x196   :  { %908 = vst [vmem:[#allocation2 + $0x8] sm:$0xff] %v906_v3  ;;  %1689 = vst [vmem:[#allocation2 + $0x18] sm:$0xff] %v1686_v20 }
 0x197   :  { %1827 = shalt.err (!%p1824_p4)
}
 0x198   :  { %s1828_s19 = scalar_lea.hbm %s2285_s3, 512 }
 0x199   :  { %p1829_p5 = scmp.ne.s32.totalorder %s2285_s3, %s1828_s19  ;;  %p1832_p6 = scmp.lt.u32.totalorder %s1828_s19, %s2285_s3 }
 0x19b   :  { %p1834_p7 = pnand %p1832_p6, %p1829_p5 }
 0x19d   :  { %1837 = shalt.err (!%p1834_p7)
}
 0x19e   :  { %s1851_s24 = smov 256  }
 0x19f   :  { %1701 = dma.vmem_to_hbm [thread:$0]  %s1696_s0, 512, %s2285_s3, [#allocation3], %s1851_s24, %s1851_s24, %s1840_s16  }
 0x1a0   :  { %1838 = dma.done.wait [#allocation3], 512  }
 0x1a1   :  { %1839 = vsyncadd [#allocation3], 4294966784 }
 0x1a2   :  { %1705 = vsyncpa [#allocation3], 1 }

</bundles_post_ra>
